<compile_context>
chip_gen: v5e
topology: v5e:2x2
jax: 0.10.0
libtpu: 0.0.40
codegen_flags: <defaults>
</compile_context>

<pallas_src>
import numpy as np

import jax
import jax.numpy as jnp
from jax.experimental import pallas as pl
from jax.experimental.pallas import tpu as pltpu


# ---------------------------------------------------------------------------
# Fused kernel: one batch block (TB rows) per grid step.
# All operands are 2-D and lane-dense; the body is 4 matmuls + 3 ReLUs.
# ---------------------------------------------------------------------------
def _cnnx1_kernel(x_ref, w1_ref, b1_ref, w2_ref, b2_ref,
                  wfc1_ref, bfc1_ref, wfc2_ref, bfc2_ref, o_ref):
    x = x_ref[...].astype(jnp.float32)                                # (TB, L*Cin)

    # conv1 + ReLU  (banded dense weight, zero padding baked into the band)
    h = jnp.dot(x, w1_ref[...], preferred_element_type=jnp.float32) + b1_ref[...]
    h = jnp.maximum(h, 0.0)                                           # (TB, L*F1)

    # conv2 + ReLU
    h = jnp.dot(h, w2_ref[...], preferred_element_type=jnp.float32) + b2_ref[...]
    h = jnp.maximum(h, 0.0)                                           # (TB, L*F2)

    # fc1 + ReLU   (PyTorch channel-major flatten folded into wfc1 host-side)
    h = jnp.dot(h, wfc1_ref[...], preferred_element_type=jnp.float32) + bfc1_ref[...]
    h = jnp.maximum(h, 0.0)                                           # (TB, 128)

    # fc2 (output padded to a lane-dense multiple of 128 columns)
    out = jnp.dot(h, wfc2_ref[...], preferred_element_type=jnp.float32) + bfc2_ref[...]
    o_ref[...] = out.astype(o_ref.dtype)                              # (TB, OUT_PAD)


def _pick_batch_block(B, L):
    """Batch tile TB (grid = B // TB steps).

    Split the batch only if every step still fills at least one MXU pass
    (TB*L >= 256) with a sublane-aligned tile (TB % 8 == 0).  Otherwise run the
    whole batch in a single step: each grid step costs ~600 cycles of pipeline
    overhead which dominates tiny matmuls.
    """
    cands = [tb for tb in range(8, B // 2 + 1, 8)
             if B % tb == 0 and tb * L >= 256]
    if not cands:
        return B                               # single grid step, whole batch
    good = [tb for tb in cands if tb * L <= 1024]
    return max(good) if good else min(cands)


def cnnx1_forward(kp, x):
    """x: (B, sequence_length, input_channels) -- same layout as the PyTorch forward."""
    B, L, C_in = x.shape
    xf = x.reshape(B, L * C_in)                # lane-major, 2-D, no in-kernel reshape
    out_dim = kp["out_dim"]
    out_pad = kp["wfc2"].shape[1]

    TB = _pick_batch_block(B, L)
    nb = B // TB

    def const_spec(a):                          # weights/biases: constant index_map
        return pl.BlockSpec(a.shape, lambda b: (0, 0))

    out = pl.pallas_call(
        _cnnx1_kernel,
        out_shape=jax.ShapeDtypeStruct((B, out_pad), jnp.float32),
        grid_spec=pltpu.PrefetchScalarGridSpec(
            num_scalar_prefetch=0,
            grid=(nb,),
            in_specs=[
                pl.BlockSpec((TB, L * C_in), lambda b: (b, 0)),       # x block
                const_spec(kp["w1"]), const_spec(kp["b1"]),           # conv1 (banded)
                const_spec(kp["w2"]), const_spec(kp["b2"]),           # conv2 (banded)
                const_spec(kp["wfc1"]), const_spec(kp["bfc1"]),       # fc1 (row-permuted)
                const_spec(kp["wfc2"]), const_spec(kp["bfc2"]),       # fc2 (lane-padded)
            ],
            out_specs=pl.BlockSpec((TB, out_pad), lambda b: (b, 0)),
        ),
        compiler_params=pltpu.CompilerParams(
            dimension_semantics=("parallel",) if nb >= 2 else ("arbitrary",)),
    )(xf, kp["w1"], kp["b1"], kp["w2"], kp["b2"],
      kp["wfc1"], kp["bfc1"], kp["wfc2"], kp["bfc2"])

    return out[:, :out_dim]


# ---------------------------------------------------------------------------
# Parameters (PyTorch layout) + one-time host-side repack into kernel layouts.
# ---------------------------------------------------------------------------
def init_params(key, input_channels, sequence_length, output_dim,
                num_filters_1, num_filters_2, kernel_size):
    ks = jax.random.split(key, 8)
    conv1_w = jax.random.normal(ks[0], (num_filters_1, input_channels, kernel_size),
                                jnp.float32) * 0.1
    conv1_b = jax.random.normal(ks[1], (num_filters_1,), jnp.float32) * 0.1
    conv2_w = jax.random.normal(ks[2], (num_filters_2, num_filters_1, kernel_size),
                                jnp.float32) * 0.1
    conv2_b = jax.random.normal(ks[3], (num_filters_2,), jnp.float32) * 0.1
    fc1_in = num_filters_2 * sequence_length
    fc1_w = jax.random.normal(ks[4], (128, fc1_in), jnp.float32) * 0.05
    fc1_b = jax.random.normal(ks[5], (128,), jnp.float32) * 0.05
    fc2_w = jax.random.normal(ks[6], (output_dim, 128), jnp.float32) * 0.05
    fc2_b = jax.random.normal(ks[7], (output_dim,), jnp.float32) * 0.05
    return dict(kernel_size=kernel_size,
                conv1_w=conv1_w, conv1_b=conv1_b,
                conv2_w=conv2_w, conv2_b=conv2_b,
                fc1_w=fc1_w, fc1_b=fc1_b,
                fc2_w=fc2_w, fc2_b=fc2_b)


def _band_conv_weight(w, L):
    """Banded dense weight W of shape (L*Cin, L*Cout) such that, for
    xf[b, l*Cin + c] = x[b, l, c]:
        (xf @ W)[b, l*Cout + f] == Conv1d(x.permute(0,2,1))[b, f, l]
    with 'same' zero padding (padding = K // 2)."""
    w = np.asarray(w, np.float32)                      # (Cout, Cin, K)
    Cout, Cin, K = w.shape
    pad = K // 2
    W = np.zeros((L, Cin, L, Cout), np.float32)
    for l_out in range(L):
        for k in range(K):
            l_in = l_out + k - pad
            if 0 <= l_in < L:
                W[l_in, :, l_out, :] = w[:, :, k].T    # (Cin, Cout)
    return W.reshape(L * Cin, L * Cout)


def prepare_kernel_params(params, sequence_length):
    """Repack PyTorch-layout weights into the fused kernel layouts (done once)."""
    L = int(sequence_length)
    F1 = params["conv1_w"].shape[0]
    F2 = params["conv2_w"].shape[0]
    H = params["fc1_w"].shape[0]
    out_dim = params["fc2_w"].shape[0]
    out_pad = max(128, -(-out_dim // 128) * 128)

    w1b = _band_conv_weight(params["conv1_w"], L)                      # (L*Cin, L*F1)
    w2b = _band_conv_weight(params["conv2_w"], L)                      # (L*F1, L*F2)

    # Conv biases broadcast over l (activation index is l*F + f).
    b1f = np.tile(np.asarray(params["conv1_b"], np.float32), L).reshape(1, L * F1)
    b2f = np.tile(np.asarray(params["conv2_b"], np.float32), L).reshape(1, L * F2)

    # PyTorch flatten index is f2*L + l; kernel activations use l*F2 + f2, so
    # permute the rows of fc1^T accordingly (host-side, one time).
    wfc1 = np.asarray(params["fc1_w"], np.float32).T                   # (F2*L, H)
    wfc1 = wfc1.reshape(F2, L, H).transpose(1, 0, 2).reshape(L * F2, H)
    bfc1 = np.asarray(params["fc1_b"], np.float32).reshape(1, H)

    # fc2 padded to a lane-dense output width.
    wfc2 = np.zeros((H, out_pad), np.float32)
    wfc2[:, :out_dim] = np.asarray(params["fc2_w"], np.float32).T
    bfc2 = np.zeros((1, out_pad), np.float32)
    bfc2[0, :out_dim] = np.asarray(params["fc2_b"], np.float32)

    return dict(out_dim=out_dim,
                w1=jnp.asarray(w1b),  b1=jnp.asarray(b1f),
                w2=jnp.asarray(w2b),  b2=jnp.asarray(b2f),
                wfc1=jnp.asarray(wfc1), bfc1=jnp.asarray(bfc1),
                wfc2=jnp.asarray(wfc2), bfc2=jnp.asarray(bfc2))


# ---------------------------------------------------------------------------
# Pure-JAX reference (mirrors the PyTorch forward) for a correctness check.
# ---------------------------------------------------------------------------
def reference_forward(params, x):
    K = params["kernel_size"]
    pad = K // 2

    def conv1d(xin, w, b):  # xin: (B, C, L); w: (Co, Ci, K); b: (Co,)
        Bsz, _, L = xin.shape
        xp = jnp.pad(xin, ((0, 0), (0, 0), (pad, pad)))
        acc = jnp.zeros((Bsz, w.shape[0], L), jnp.float32)
        for k in range(K):
            acc = acc + jnp.einsum("bcl,oc->bol", xp[:, :, k:k + L], w[:, :, k])
        return acc + b[None, :, None]

    xn = jnp.transpose(x, (0, 2, 1))                   # x.permute(0, 2, 1)
    h1 = jax.nn.relu(conv1d(xn, params["conv1_w"], params["conv1_b"]))
    h2 = jax.nn.relu(conv1d(h1, params["conv2_w"], params["conv2_b"]))
    flat = h2.reshape(h2.shape[0], -1)                 # x.view(B, -1)
    h = jax.nn.relu(flat @ params["fc1_w"].T + params["fc1_b"])
    return h @ params["fc2_w"].T + params["fc2_b"]


if __name__ == "__main__":
    B = 2
    input_channels = 4
    sequence_length = 16
    output_dim = 5
    num_filters_1 = 8
    num_filters_2 = 8
    kernel_size = 3

    key = jax.random.PRNGKey(0)
    pkey, xkey = jax.random.split(key)
    params = init_params(pkey, input_channels, sequence_length, output_dim,
                         num_filters_1, num_filters_2, kernel_size)
    kparams = prepare_kernel_params(params, sequence_length)
    x = jax.random.normal(xkey, (B, sequence_length, input_channels), jnp.float32)

    out = jax.block_until_ready(cnnx1_forward(kparams, x))

    ref = reference_forward(params, x)
    assert out.shape == (B, output_dim), out.shape
    max_err = float(jnp.max(jnp.abs(out - ref)))
    assert jnp.allclose(out, ref, atol=1e-4, rtol=1e-4), max_err
    print("KERNEL_OK")
</pallas_src>

<mosaic_0001>
module attributes {stable_mosaic.version = 11 : i64} {
  func.func @_cnnx1_kernel(%arg0: i32, %arg1: memref<2x64xf32, #tpu.memory_space<vmem>>, %arg2: memref<64x128xf32, #tpu.memory_space<vmem>>, %arg3: memref<1x128xf32, #tpu.memory_space<vmem>>, %arg4: memref<128x128xf32, #tpu.memory_space<vmem>>, %arg5: memref<1x128xf32, #tpu.memory_space<vmem>>, %arg6: memref<128x128xf32, #tpu.memory_space<vmem>>, %arg7: memref<1x128xf32, #tpu.memory_space<vmem>>, %arg8: memref<128x128xf32, #tpu.memory_space<vmem>>, %arg9: memref<1x128xf32, #tpu.memory_space<vmem>>, %arg10: memref<2x128xf32, #tpu.memory_space<vmem>>) attributes {dimension_semantics = [#tpu.dimension_semantics<arbitrary>], iteration_bounds = array<i64: 1>, scalar_prefetch = 0 : i64, scratch_operands = 0 : i64, tpu.core_type = #tpu.core_type<tc>, window_params = [{transform_indices = @transform_0, window_bounds = array<i64: 2, 64>}, {pipeline_mode = #tpu.pipeline_mode<synchronous>, transform_indices = @transform_1, window_bounds = array<i64: 64, 128>}, {pipeline_mode = #tpu.pipeline_mode<synchronous>, transform_indices = @transform_2, window_bounds = array<i64: 1, 128>}, {pipeline_mode = #tpu.pipeline_mode<synchronous>, transform_indices = @transform_3, window_bounds = array<i64: 128, 128>}, {pipeline_mode = #tpu.pipeline_mode<synchronous>, transform_indices = @transform_4, window_bounds = array<i64: 1, 128>}, {pipeline_mode = #tpu.pipeline_mode<synchronous>, transform_indices = @transform_5, window_bounds = array<i64: 128, 128>}, {pipeline_mode = #tpu.pipeline_mode<synchronous>, transform_indices = @transform_6, window_bounds = array<i64: 1, 128>}, {pipeline_mode = #tpu.pipeline_mode<synchronous>, transform_indices = @transform_7, window_bounds = array<i64: 128, 128>}, {pipeline_mode = #tpu.pipeline_mode<synchronous>, transform_indices = @transform_8, window_bounds = array<i64: 1, 128>}, {transform_indices = @transform_9, window_bounds = array<i64: 2, 128>}]} {
    %c0 = arith.constant 0 : index
    %c0_0 = arith.constant 0 : index
    %0 = vector.load %arg1[%c0, %c0_0] : memref<2x64xf32, #tpu.memory_space<vmem>>, vector<2x64xf32>
    %c0_1 = arith.constant 0 : index
    %c0_2 = arith.constant 0 : index
    %1 = vector.load %arg2[%c0_1, %c0_2] : memref<64x128xf32, #tpu.memory_space<vmem>>, vector<64x128xf32>
    %cst = arith.constant dense<0.000000e+00> : vector<2x128xf32>
    %2 = tpu.matmul %0, %1, %cst {dimension_numbers = #tpu.dot_dimension_numbers<[1], [0], [0], [1], [0, 0, 1, 1], [], []>} : vector<2x64xf32>, vector<64x128xf32>, vector<2x128xf32> -> vector<2x128xf32>
    %c0_3 = arith.constant 0 : index
    %c0_4 = arith.constant 0 : index
    %3 = vector.load %arg3[%c0_3, %c0_4] : memref<1x128xf32, #tpu.memory_space<vmem>>, vector<1x128xf32>
    %4 = vector.broadcast %3 : vector<1x128xf32> to vector<2x128xf32>
    %5 = arith.addf %2, %4 : vector<2x128xf32>
    %cst_5 = arith.constant 0.000000e+00 : f32
    %6 = vector.broadcast %cst_5 : f32 to vector<2x128xf32>
    %7 = arith.maximumf %5, %6 : vector<2x128xf32>
    %c0_6 = arith.constant 0 : index
    %c0_7 = arith.constant 0 : index
    %8 = vector.load %arg4[%c0_6, %c0_7] : memref<128x128xf32, #tpu.memory_space<vmem>>, vector<128x128xf32>
    %cst_8 = arith.constant dense<0.000000e+00> : vector<2x128xf32>
    %9 = tpu.matmul %7, %8, %cst_8 {dimension_numbers = #tpu.dot_dimension_numbers<[1], [0], [0], [1], [0, 0, 1, 1], [], []>} : vector<2x128xf32>, vector<128x128xf32>, vector<2x128xf32> -> vector<2x128xf32>
    %c0_9 = arith.constant 0 : index
    %c0_10 = arith.constant 0 : index
    %10 = vector.load %arg5[%c0_9, %c0_10] : memref<1x128xf32, #tpu.memory_space<vmem>>, vector<1x128xf32>
    %11 = vector.broadcast %10 : vector<1x128xf32> to vector<2x128xf32>
    %12 = arith.addf %9, %11 : vector<2x128xf32>
    %cst_11 = arith.constant 0.000000e+00 : f32
    %13 = vector.broadcast %cst_11 : f32 to vector<2x128xf32>
    %14 = arith.maximumf %12, %13 : vector<2x128xf32>
    %c0_12 = arith.constant 0 : index
    %c0_13 = arith.constant 0 : index
    %15 = vector.load %arg6[%c0_12, %c0_13] : memref<128x128xf32, #tpu.memory_space<vmem>>, vector<128x128xf32>
    %cst_14 = arith.constant dense<0.000000e+00> : vector<2x128xf32>
    %16 = tpu.matmul %14, %15, %cst_14 {dimension_numbers = #tpu.dot_dimension_numbers<[1], [0], [0], [1], [0, 0, 1, 1], [], []>} : vector<2x128xf32>, vector<128x128xf32>, vector<2x128xf32> -> vector<2x128xf32>
    %c0_15 = arith.constant 0 : index
    %c0_16 = arith.constant 0 : index
    %17 = vector.load %arg7[%c0_15, %c0_16] : memref<1x128xf32, #tpu.memory_space<vmem>>, vector<1x128xf32>
    %18 = vector.broadcast %17 : vector<1x128xf32> to vector<2x128xf32>
    %19 = arith.addf %16, %18 : vector<2x128xf32>
    %cst_17 = arith.constant 0.000000e+00 : f32
    %20 = vector.broadcast %cst_17 : f32 to vector<2x128xf32>
    %21 = arith.maximumf %19, %20 : vector<2x128xf32>
    %c0_18 = arith.constant 0 : index
    %c0_19 = arith.constant 0 : index
    %22 = vector.load %arg8[%c0_18, %c0_19] : memref<128x128xf32, #tpu.memory_space<vmem>>, vector<128x128xf32>
    %cst_20 = arith.constant dense<0.000000e+00> : vector<2x128xf32>
    %23 = tpu.matmul %21, %22, %cst_20 {dimension_numbers = #tpu.dot_dimension_numbers<[1], [0], [0], [1], [0, 0, 1, 1], [], []>} : vector<2x128xf32>, vector<128x128xf32>, vector<2x128xf32> -> vector<2x128xf32>
    %c0_21 = arith.constant 0 : index
    %c0_22 = arith.constant 0 : index
    %24 = vector.load %arg9[%c0_21, %c0_22] : memref<1x128xf32, #tpu.memory_space<vmem>>, vector<1x128xf32>
    %25 = vector.broadcast %24 : vector<1x128xf32> to vector<2x128xf32>
    %26 = arith.addf %23, %25 : vector<2x128xf32>
    %c0_23 = arith.constant 0 : index
    %c0_24 = arith.constant 0 : index
    %27 = vector.load %arg10[%c0_23, %c0_24] : memref<2x128xf32, #tpu.memory_space<vmem>>, vector<2x128xf32>
    tpu.vector_store %arg10[%c0_23, %c0_24], %26 {strides = array<i32>} : memref<2x128xf32, #tpu.memory_space<vmem>>, vector<2x128xf32>,
    return
  }
  func.func @transform_0(%arg0: i32) -> (i32, i32) {
    %c0_i32 = arith.constant 0 : i32
    %c0_i32_0 = arith.constant 0 : i32
    return %arg0, %c0_i32 : i32, i32
  }
  func.func @transform_1(%arg0: i32) -> (i32, i32) {
    %c0_i32 = arith.constant 0 : i32
    %c0_i32_0 = arith.constant 0 : i32
    %c0_i32_1 = arith.constant 0 : i32
    return %c0_i32, %c0_i32_0 : i32, i32
  }
  func.func @transform_2(%arg0: i32) -> (i32, i32) {
    %c0_i32 = arith.constant 0 : i32
    %c0_i32_0 = arith.constant 0 : i32
    %c0_i32_1 = arith.constant 0 : i32
    return %c0_i32, %c0_i32_0 : i32, i32
  }
  func.func @transform_3(%arg0: i32) -> (i32, i32) {
    %c0_i32 = arith.constant 0 : i32
    %c0_i32_0 = arith.constant 0 : i32
    %c0_i32_1 = arith.constant 0 : i32
    return %c0_i32, %c0_i32_0 : i32, i32
  }
  func.func @transform_4(%arg0: i32) -> (i32, i32) {
    %c0_i32 = arith.constant 0 : i32
    %c0_i32_0 = arith.constant 0 : i32
    %c0_i32_1 = arith.constant 0 : i32
    return %c0_i32, %c0_i32_0 : i32, i32
  }
  func.func @transform_5(%arg0: i32) -> (i32, i32) {
    %c0_i32 = arith.constant 0 : i32
    %c0_i32_0 = arith.constant 0 : i32
    %c0_i32_1 = arith.constant 0 : i32
    return %c0_i32, %c0_i32_0 : i32, i32
  }
  func.func @transform_6(%arg0: i32) -> (i32, i32) {
    %c0_i32 = arith.constant 0 : i32
    %c0_i32_0 = arith.constant 0 : i32
    %c0_i32_1 = arith.constant 0 : i32
    return %c0_i32, %c0_i32_0 : i32, i32
  }
  func.func @transform_7(%arg0: i32) -> (i32, i32) {
    %c0_i32 = arith.constant 0 : i32
    %c0_i32_0 = arith.constant 0 : i32
    %c0_i32_1 = arith.constant 0 : i32
    return %c0_i32, %c0_i32_0 : i32, i32
  }
  func.func @transform_8(%arg0: i32) -> (i32, i32) {
    %c0_i32 = arith.constant 0 : i32
    %c0_i32_0 = arith.constant 0 : i32
    %c0_i32_1 = arith.constant 0 : i32
    return %c0_i32, %c0_i32_0 : i32, i32
  }
  func.func @transform_9(%arg0: i32) -> (i32, i32) {
    %c0_i32 = arith.constant 0 : i32
    %c0_i32_0 = arith.constant 0 : i32
    return %arg0, %c0_i32 : i32, i32
  }
}

</mosaic_0001>

<bundles_post_ra>
// kernel: tpu_custom_call.1
= control target key start
LH: loop header
LB: loop body
LE: loop exit
PB: predicated region body
PF: predicated region fallthrough
CT: control target
= control target key end

     0   :  { %14 = vsyncpa [#allocation3], 0  ;;  %s542_s0 = inlined_call_operand.hbm [shape: f32[2,64], index: 0, kind: input, shape index: {}]   ;;  %s543_s1 = inlined_call_operand.hbm [shape: f32[64,128], index: 1, kind: input, shape index: {}]   ;;  %s544_s2 = inlined_call_operand.vmem [shape: f32[1,128], index: 2, kind: input, shape index: {}]   ;;  %s545_s3 = inlined_call_operand.hbm [shape: f32[128,128], index: 3, kind: input, shape index: {}]   ;;  %s546_s4 = inlined_call_operand.vmem [shape: f32[1,128], index: 4, kind: input, shape index: {}]   ;;  %s547_s5 = inlined_call_operand.hbm [shape: f32[128,128], index: 5, kind: input, shape index: {}]   ;;  %s548_s6 = inlined_call_operand.vmem [shape: f32[1,128], index: 6, kind: input, shape index: {}]   ;;  %s549_s7 = inlined_call_operand.hbm [shape: f32[128,128], index: 7, kind: input, shape index: {}]   ;;  %s550_s8 = inlined_call_operand.vmem [shape: f32[1,128], index: 8, kind: input, shape index: {}]   ;;  %s551_s9 = inlined_call_operand.hbm [shape: f32[2,128], index: 9, kind: output, shape index: {}]  }
   0x1   :  { %15 = vsyncpa [#allocation6], 0 }
   0x2   :  { %16 = vsyncpa [#allocation9], 0  ;;  %s33_s11 = sshll.u32 %s543_s1, 4  ;;  %s34_s11 = int_to_ptr.hbm [resolvable:$true] %s33_s11 }
   0x3   :  { %17 = vsyncpa [#allocation4], 0  ;;  %s454_s12 = smov [#allocation5]   ;;  %s63_s16 = sshll.u32 %s547_s5, 4  ;;  %s64_s16 = int_to_ptr.hbm [resolvable:$true] %s63_s16 }
   0x4   :  { %s35_s13 = sshll.u32 %s454_s12, 4  ;;  %s455_s17 = smov 128   ;;  %s36_s13 = int_to_ptr.vmem [resolvable:$true] %s35_s13 }
   0x5   :  { %s456_s18 = smov 8   ;;  %s457_s19 = smov [#allocation8]  }
   0x6   :  { %41 = dma.hbm_to_vmem [thread:$0]  %s34_s11, 1024, %s36_s13, [#allocation6], %s455_s17, %s455_s17, %s456_s18  }
   0x7   :  { %s65_s20 = sshll.u32 %s457_s19, 4  ;;  %s23_s23 = sshll.u32 %s542_s0, 4  ;;  %s66_s20 = int_to_ptr.vmem [resolvable:$true] %s65_s20  ;;  %s24_s23 = int_to_ptr.hbm [resolvable:$true] %s23_s23 }
   0x8   :  { %71 = dma.hbm_to_vmem [thread:$0]  %s64_s16, 2048, %s66_s20, [#allocation9], %s455_s17, %s455_s17, %s456_s18  }
   0x9   :  { %s48_s25 = sshll.u32 %s545_s3, 4  ;;  %s458_s26 = smov [#allocation2]   ;;  %s49_s25 = int_to_ptr.hbm [resolvable:$true] %s48_s25 }
   0xa   :  { %s25_s27 = sshll.u32 %s458_s26, 4  ;;  %s459_s5 = smov [#allocation7]   ;;  %s26_s27 = int_to_ptr.vmem [resolvable:$true] %s25_s27 }
   0xb   :  { %28 = dma.hbm_to_vmem [thread:$0]  %s24_s23, 32, %s26_s27, [#allocation3]  }
   0xc   :  { %s50_s28 = sshll.u32 %s459_s5, 4  ;;  %s78_s10 = sshll.u32 %s549_s7, 4  ;;  %s51_s28 = int_to_ptr.vmem [resolvable:$true] %s50_s28  ;;  %s79_s10 = int_to_ptr.hbm [resolvable:$true] %s78_s10 }
   0xd   :  { %56 = dma.hbm_to_vmem [thread:$0]  %s49_s25, 2048, %s51_s28, [#allocation6], %s455_s17, %s455_s17, %s456_s18  }
   0xe   :  { %s460_s0 = smov [#allocation10]  }
   0xf   :  { %s80_s11 = sshll.u32 %s460_s0, 4  ;;  %s81_s11 = int_to_ptr.vmem [resolvable:$true] %s80_s11 }
  0x10   :  { %86 = dma.hbm_to_vmem [thread:$0]  %s79_s10, 2048, %s81_s11, [#allocation9], %s455_s17, %s455_s17, %s456_s18  }
  0x11   :  { %446 = dma.done.wait [#allocation3], 32  }
  0x12   :  { %447 = vsyncadd [#allocation3], 4294967264 }
  0x13   :  { %448 = dma.done.wait [#allocation6], 3072  }
  0x14   :  { %449 = vsyncadd [#allocation6], 4294964224 }
  0x15   :  { %450 = dma.done.wait [#allocation9], 4096  }
  0x16   :  { %451 = vsyncadd [#allocation9], 4294963200  ;;  %v117_v0 = vld [vmem:[#allocation5 + $0x38] sm:$0xff]  ;;  %v116_v1 = vld [vmem:[#allocation5 + $0x30] sm:$0xff]  ;;  %vm122_vm0 = vcmask 523264   ;;  %s461_s16 = smov [#allocation11]  }
  0x17   :  { %134 = vmatpush.msra.mxu0 %v117_v0  ;;  %v115_v2 = vld [vmem:[#allocation5 + $0x28] sm:$0xff]  ;;  %v162_v3 = vld [vmem:[#allocation7 + $0x78] sm:$0xff]  ;;  %v161_v4 = vld [vmem:[#allocation7 + $0x70] sm:$0xff]  ;;  %s275_s17 = sshll.u32 %s461_s16, 4  ;;  %s277_s20 = sshll.u32 %s551_s9, 4  ;;  %s276_s17 = int_to_ptr.vmem [resolvable:$true] %s275_s17  ;;  %s278_s20 = int_to_ptr.hbm [resolvable:$true] %s277_s20 }
  0x18   :  { %v114_v5 = vld [vmem:[#allocation5 + $0x20] sm:$0xff]  ;;  %167 = vmatpush.msra.mxu1 %v162_v3  ;;  %v160_v6 = vld [vmem:[#allocation7 + $0x68] sm:$0xff]  ;;  %v113_v7 = vld [vmem:[#allocation5 + $0x18] sm:$0xff] }
  0x19   :  { %135 = vmatpush.msra.mxu0 %v116_v1  ;;  %v112_v8 = vld [vmem:[#allocation5 + $0x10] sm:$0xff]  ;;  %v159_v9 = vld [vmem:[#allocation7 + $0x60] sm:$0xff]  ;;  %v158_v10 = vld [vmem:[#allocation7 + $0x58] sm:$0xff] }
  0x1a   :  { %168 = vmatpush.msra.mxu1 %v161_v4  ;;  %v111_v11 = vld [vmem:[#allocation5 + $0x8] sm:$0xff]  ;;  %v157_v12 = vld [vmem:[#allocation7 + $0x50] sm:$0xff]  ;;  %v110_v13 = vld [vmem:[#allocation5] sm:$0xff] }
  0x1b   :  { %136 = vmatpush.msra.mxu0 %v115_v2  ;;  %v109_v14 = vld [vmem:[#allocation2] sm:$0x3]  ;;  %v156_v15 = vld [vmem:[#allocation7 + $0x48] sm:$0xff]  ;;  %v155_v16 = vld [vmem:[#allocation7 + $0x40] sm:$0xff] }
  0x1c   :  { %169 = vmatpush.msra.mxu1 %v160_v6  ;;  %v154_v17 = vld [vmem:[#allocation7 + $0x38] sm:$0xff]  ;;  %v153_v18 = vld [vmem:[#allocation7 + $0x30] sm:$0xff]  ;;  %v152_v19 = vld [vmem:[#allocation7 + $0x28] sm:$0xff] }
  0x1d   :  { %137 = vmatpush.msra.mxu0 %v114_v5  ;;  %v151_v20 = vld [vmem:[#allocation7 + $0x20] sm:$0xff]  ;;  %v150_v21 = vld [vmem:[#allocation7 + $0x18] sm:$0xff]  ;;  %v149_v22 = vld [vmem:[#allocation7 + $0x10] sm:$0xff] }
  0x1e   :  { %170 = vmatpush.msra.mxu1 %v159_v9  ;;  %v148_v23 = vld [vmem:[#allocation7 + $0x8] sm:$0xff]  ;;  %v147_v24 = vld [vmem:[#allocation7] sm:$0xff]  ;;  %v203_v25 = vld [vmem:[#allocation8 + $0x78] sm:$0xff] }
  0x1f   :  { %138 = vmatpush.msra.mxu0 %v113_v7  ;;  %v202_v26 = vld [vmem:[#allocation8 + $0x70] sm:$0xff]  ;;  %208 = vmatpush.msra.mxu2 %v203_v25  ;;  %v201_v27 = vld [vmem:[#allocation8 + $0x68] sm:$0xff]  ;;  %v200_v28 = vld [vmem:[#allocation8 + $0x60] sm:$0xff] }
  0x20   :  { %171 = vmatpush.msra.mxu1 %v158_v10  ;;  %v199_v29 = vld [vmem:[#allocation8 + $0x58] sm:$0xff]  ;;  %v198_v30 = vld [vmem:[#allocation8 + $0x50] sm:$0xff]  ;;  %v197_v31 = vld [vmem:[#allocation8 + $0x48] sm:$0xff] }
  0x21   :  { %139 = vmatpush.msra.mxu0 %v112_v8  ;;  %209 = vmatpush.msra.mxu2 %v202_v26  ;;  %v196_v32 = vld [vmem:[#allocation8 + $0x40] sm:$0xff]  ;;  %v195_v33 = vld [vmem:[#allocation8 + $0x38] sm:$0xff]  ;;  %v194_v34 = vld [vmem:[#allocation8 + $0x30] sm:$0xff] }
  0x22   :  { %172 = vmatpush.msra.mxu1 %v157_v12  ;;  %v193_v35 = vld [vmem:[#allocation8 + $0x28] sm:$0xff]  ;;  %v192_v36 = vld [vmem:[#allocation8 + $0x20] sm:$0xff]  ;;  %v191_v37 = vld [vmem:[#allocation8 + $0x18] sm:$0xff] }
  0x23   :  { %140 = vmatpush.msra.mxu0 %v111_v11  ;;  %210 = vmatpush.msra.mxu2 %v201_v27  ;;  %v298_v38 = vld [vmem:[%s544_s2] ss:$0 sm:$0xff]  ;;  %v190_v42 = vld [vmem:[#allocation8 + $0x10] sm:$0xff]  ;;  %v189_v43 = vld [vmem:[#allocation8 + $0x8] sm:$0xff] }
  0x24   :  { %173 = vmatpush.msra.mxu1 %v156_v15  ;;  %v188_v44 = vld [vmem:[#allocation8] sm:$0xff]  ;;  %v244_v45 = vld [vmem:[#allocation10 + $0x78] sm:$0xff]  ;;  %v243_v46 = vld [vmem:[#allocation10 + $0x70] sm:$0xff] }
  0x25   :  { %141 = vmatpush.msra.mxu0 %v110_v13  ;;  %211 = vmatpush.msra.mxu2 %v200_v28  ;;  %v242_v47 = vld [vmem:[#allocation10 + $0x68] sm:$0xff]  ;;  %v241_v48 = vld [vmem:[#allocation10 + $0x60] sm:$0xff]  ;;  %v240_v49 = vld [vmem:[#allocation10 + $0x58] sm:$0xff] }
  0x26   :  { %289 = vmatmul.msk.f32.vlgmr.msra.gmra.mxu0 %vm122_vm0, %v109_v14  ;;  %174 = vmatpush.msra.mxu1 %v155_v16  ;;  %v239_v50 = vld [vmem:[#allocation10 + $0x50] sm:$0xff]  ;;  %v238_v51 = vld [vmem:[#allocation10 + $0x48] sm:$0xff]  ;;  %v237_v52 = vld [vmem:[#allocation10 + $0x40] sm:$0xff] }
  0x27   :  { %212 = vmatpush.msra.mxu2 %v199_v29  ;;  %249 = vmatpush.msra.mxu3 %v244_v45  ;;  %v236_v53 = vld [vmem:[#allocation10 + $0x38] sm:$0xff]  ;;  %v235_v54 = vld [vmem:[#allocation10 + $0x30] sm:$0xff]  ;;  %v234_v55 = vld [vmem:[#allocation10 + $0x28] sm:$0xff] }
  0x28   :  { %175 = vmatpush.msra.mxu1 %v154_v17  ;;  %v233_v56 = vld [vmem:[#allocation10 + $0x20] sm:$0xff]  ;;  %v232_v57 = vld [vmem:[#allocation10 + $0x18] sm:$0xff]  ;;  %v231_v62 = vld [vmem:[#allocation10 + $0x10] sm:$0xff] }
  0x29   :  { %213 = vmatpush.msra.mxu2 %v198_v30  ;;  %250 = vmatpush.msra.mxu3 %v243_v46  ;;  %v299_v58 = vld [vmem:[%s546_s4] ss:$0 sm:$0xff]  ;;  %v230_v63 = vld [vmem:[#allocation10 + $0x8] sm:$0xff]  ;;  %v229_v0 = vld [vmem:[#allocation10] sm:$0xff] }
  0x2a   :  { %176 = vmatpush.msra.mxu1 %v153_v18  ;;  %v300_v1 = vld [vmem:[%s548_s6] ss:$0 sm:$0xff] }
  0x2b   :  { %214 = vmatpush.msra.mxu2 %v197_v31  ;;  %251 = vmatpush.msra.mxu3 %v242_v47  ;;  %v301_v5 = vld [vmem:[%s550_s8] ss:$0 sm:$0xff] }
  0x2c   :  { %177 = vmatpush.msra.mxu1 %v152_v19 }
  0x2d   :  { %215 = vmatpush.msra.mxu2 %v196_v32  ;;  %252 = vmatpush.msra.mxu3 %v241_v48 }
  0x2e   :  { %178 = vmatpush.msra.mxu1 %v151_v20 }
  0x2f   :  { %216 = vmatpush.msra.mxu2 %v195_v33  ;;  %253 = vmatpush.msra.mxu3 %v240_v49 }
  0x30   :  { %179 = vmatpush.msra.mxu1 %v150_v21 }
  0x31   :  { %217 = vmatpush.msra.mxu2 %v194_v34  ;;  %254 = vmatpush.msra.mxu3 %v239_v50 }
  0x32   :  { %180 = vmatpush.msra.mxu1 %v149_v22 }
  0x33   :  { %218 = vmatpush.msra.mxu2 %v193_v35  ;;  %255 = vmatpush.msra.mxu3 %v238_v51 }
  0x34   :  { %181 = vmatpush.msra.mxu1 %v148_v23 }
  0x35   :  { %219 = vmatpush.msra.mxu2 %v192_v36  ;;  %256 = vmatpush.msra.mxu3 %v237_v52 }
  0x36   :  { %182 = vmatpush.msra.mxu1 %v147_v24 }
  0x37   :  { %220 = vmatpush.msra.mxu2 %v191_v37  ;;  %257 = vmatpush.msra.mxu3 %v236_v53 }
  0x39   :  { %221 = vmatpush.msra.mxu2 %v190_v42  ;;  %258 = vmatpush.msra.mxu3 %v235_v54 }
  0x3b   :  { %222 = vmatpush.msra.mxu2 %v189_v43  ;;  %259 = vmatpush.msra.mxu3 %v234_v55 }
  0x3d   :  { %223 = vmatpush.msra.mxu2 %v188_v44  ;;  %260 = vmatpush.msra.mxu3 %v233_v56 }
  0x3f   :  { %261 = vmatpush.msra.mxu3 %v232_v57 }
  0x41   :  { %262 = vmatpush.msra.mxu3 %v231_v62 }
  0x43   :  { %263 = vmatpush.msra.mxu3 %v230_v63 }
  0x45   :  { %264 = vmatpush.msra.mxu3 %v229_v0 }
  0xa3   :  { %v143_v39 = vpop.f32.mrf.mxu0 }
  0xa4   :  { %v144_v40 = vadd.f32 %v298_v38, %v143_v39 }
  0xa6   :  { %v146_v41 = vmax.f32 %v144_v40, 0.0 }
  0xa8   :  { %183 = vmatmul.f32.vlgmr.msra.gmra.mxu1 %v146_v41 }
 0x125   :  { %v184_v59 = vpop.f32.mrf.mxu1 }
 0x126   :  { %v185_v60 = vadd.f32 %v299_v58, %v184_v59 }
 0x128   :  { %v187_v61 = vmax.f32 %v185_v60, 0.0 }
 0x12a   :  { %224 = vmatmul.f32.vlgmr.msra.gmra.mxu2 %v187_v61 }
 0x1ad   :  { %v225_v2 = vpop.f32.mrf.mxu2 }
 0x1ae   :  { %v226_v3 = vadd.f32 %v300_v1, %v225_v2 }
 0x1b0   :  { %v228_v4 = vmax.f32 %v226_v3, 0.0 }
 0x1b2   :  { %265 = vmatmul.f32.vlgmr.msra.gmra.mxu3 %v228_v4 }
 0x235   :  { %v266_v6 = vpop.f32.mrf.mxu3 }
 0x236   :  { %v267_v7 = vadd.f32 %v301_v5, %v266_v6 }
 0x238   :  { %269 = vst [vmem:[#allocation11] sm:$0x3] %v267_v7 }
 0x239   :  { %280 = dma.vmem_to_hbm [thread:$0]  %s276_s17, 32, %s278_s20, [#allocation4]  }
 0x23a   :  { %452 = dma.done.wait [#allocation4], 32  }
 0x23b   :  { %453 = vsyncadd [#allocation4], 4294967264 }
 0x23c   :  { %285 = vsyncpa [#allocation3], 1 }
 0x23d   :  { %286 = vsyncpa [#allocation6], 1 }
 0x23e   :  { %287 = vsyncpa [#allocation9], 1 }
 0x23f   :  { %288 = vsyncpa [#allocation4], 1 }

</bundles_post_ra>
